<compile_context>
chip_gen: v7x
topology: tpu7x:2x2x1
jax: 0.10.0
libtpu: 0.0.40
codegen_flags: <defaults>
</compile_context>

<pallas_src>
import math

import numpy as np
import jax
import jax.numpy as jnp
from jax.experimental import pallas as pl
from jax.experimental.pallas import tpu as pltpu

# ---------------------------------------------------------------------------
# Problem sizes (small, consistent with the module's __init__ signature)
# ---------------------------------------------------------------------------
VOCAB = 64     # vocab_size
SEQ = 8        # seq_len
DIM = 128      # embedding_dim (lane-aligned)
BATCH = 2


# ---------------------------------------------------------------------------
# Pallas kernel: single invocation, no grid.  Embedding gather is a {0,1}
# one-hot matmul on the MXU; sqrt(D) scale and the broadcasted positional-
# encoding add happen in the VPU epilogue on the lane-dense (N, D) output.
# ---------------------------------------------------------------------------
def embed_pe_kernel(ids_ref, emb_ref, pe_ref, out_ref):
    # ids_ref: (N, 1) int32   where N = B * S   (full array in VMEM)
    # emb_ref: (V, D) float32 (full embedding table in VMEM, single-buffered)
    # pe_ref : (S, D) float32 (positional-encoding table in VMEM)
    # out_ref: (N, D) float32 (lane-dense output block)
    N = ids_ref.shape[0]
    V, D = emb_ref.shape
    S = pe_ref.shape[0]
    B = N // S

    ids = ids_ref[...]                                          # (N, 1) int32
    # Exact {0,1} one-hot selector: representable at any MXU precision, so the
    # matmul result is bit-exact vs. a row gather on v5e / v6e / v7x.
    # TODO(synk): out-of-range / negative ids silently yield an all-zero row
    # (output = PE only) instead of raising like nn.Embedding; inputs are
    # assumed to be valid vocab indices.
    iota = jax.lax.broadcasted_iota(jnp.int32, (N, V), 1)       # (N, V)
    one_hot = jnp.where(iota == ids, jnp.float32(1.0), jnp.float32(0.0))

    emb = jnp.dot(one_hot, emb_ref[...],
                  preferred_element_type=jnp.float32)           # (N, D)

    # VPU epilogue (f32, v5e-safe): scale + broadcasted PE add.  The
    # (N, D) -> (B, S, D) split is sublane/vreg-aligned (16 -> 2x8), so the
    # reshapes are layout no-ops and no (N, D) PE copy is materialized.
    scale = jnp.float32(math.sqrt(D))
    out = (emb * scale).reshape(B, S, D) + pe_ref[...][None, :, :]
    out_ref[...] = out.reshape(N, D).astype(out_ref.dtype)


def embedding_layer(ids, emb_table, pe_table):
    B, S = ids.shape
    V, D = emb_table.shape
    N = B * S
    ids_flat = ids.reshape(N, 1).astype(jnp.int32)

    vmem_full = pl.BlockSpec(memory_space=pltpu.MemorySpace.VMEM)
    out_flat = pl.pallas_call(
        embed_pe_kernel,
        out_shape=jax.ShapeDtypeStruct((N, D), jnp.float32),
        in_specs=[vmem_full, vmem_full, vmem_full],   # ids, table, PE (full)
        out_specs=vmem_full,
    )(ids_flat, emb_table, pe_table)

    # Layout plumbing only: present the result as (B, S, D).
    return out_flat.reshape(B, S, D)


# ---------------------------------------------------------------------------
# Parameter construction (deterministic, mirrors the PyTorch module's init)
# ---------------------------------------------------------------------------
def make_positional_encoding(seq_len, embedding_dim):
    pe = np.zeros((seq_len, embedding_dim), dtype=np.float32)
    position = np.arange(0.0, seq_len, dtype=np.float32)[:, None]
    div_term = np.exp(np.arange(0.0, embedding_dim, 2, dtype=np.float32)
                      * -(math.log(10000.0) / embedding_dim))
    pe[:, 0::2] = np.sin(position * div_term)
    pe[:, 1::2] = np.cos(position * div_term)
    return jnp.asarray(pe)


if __name__ == "__main__":
    key = jax.random.PRNGKey(0)
    k_emb, k_ids = jax.random.split(key)

    # nn.Embedding default init: N(0, 1)
    emb_table = jax.random.normal(k_emb, (VOCAB, DIM), dtype=jnp.float32)
    pe_table = make_positional_encoding(SEQ, DIM)
    ids = jax.random.randint(k_ids, (BATCH, SEQ), 0, VOCAB, dtype=jnp.int32)

    out = embedding_layer(ids, emb_table, pe_table)
    out = jax.block_until_ready(out)

    # Pure-JAX reference for sanity.
    ref = emb_table[ids] * math.sqrt(DIM) + pe_table[None, :, :]
    assert out.shape == (BATCH, SEQ, DIM)
    assert np.allclose(np.asarray(out), np.asarray(ref), atol=1e-4, rtol=1e-4)

    print("KERNEL_OK")
</pallas_src>

<mosaic_0001>
module attributes {stable_mosaic.version = 11 : i64} {
  func.func @embed_pe_kernel(%arg0: memref<16x1xi32, #tpu.memory_space<vmem>>, %arg1: memref<64x128xf32, #tpu.memory_space<vmem>>, %arg2: memref<8x128xf32, #tpu.memory_space<vmem>>, %arg3: memref<16x128xf32, #tpu.memory_space<vmem>>) attributes {dimension_semantics = [], scalar_prefetch = 0 : i64, scratch_operands = 0 : i64, tpu.core_type = #tpu.core_type<tc>} {
    %c0 = arith.constant 0 : index
    %c0_0 = arith.constant 0 : index
    %0 = vector.load %arg0[%c0, %c0_0] : memref<16x1xi32, #tpu.memory_space<vmem>>, vector<16x1xi32>
    %1 = tpu.iota {dimensions = array<i32: 1>} : vector<16x64xi32>
    %2 = vector.broadcast %0 : vector<16x1xi32> to vector<16x64xi32>
    %3 = arith.cmpi eq, %1, %2 : vector<16x64xi32>
    %cst = arith.constant 1.000000e+00 : f32
    %cst_1 = arith.constant 0.000000e+00 : f32
    %4 = vector.broadcast %cst : f32 to vector<16x64xf32>
    %5 = vector.broadcast %cst_1 : f32 to vector<16x64xf32>
    %6 = arith.select %3, %4, %5 : vector<16x64xi1>, vector<16x64xf32>
    %c0_2 = arith.constant 0 : index
    %c0_3 = arith.constant 0 : index
    %7 = vector.load %arg1[%c0_2, %c0_3] : memref<64x128xf32, #tpu.memory_space<vmem>>, vector<64x128xf32>
    %cst_4 = arith.constant dense<0.000000e+00> : vector<16x128xf32>
    %8 = tpu.matmul %6, %7, %cst_4 {dimension_numbers = #tpu.dot_dimension_numbers<[1], [0], [0], [1], [0, 0, 1, 1], [], []>} : vector<16x64xf32>, vector<64x128xf32>, vector<16x128xf32> -> vector<16x128xf32>
    %cst_5 = arith.constant 11.3137083 : f32
    %9 = vector.broadcast %cst_5 : f32 to vector<16x128xf32>
    %10 = arith.mulf %8, %9 : vector<16x128xf32>
    %11 = vector.shape_cast %10 : vector<16x128xf32> to vector<2x8x128xf32>
    %c0_6 = arith.constant 0 : index
    %c0_7 = arith.constant 0 : index
    %12 = vector.load %arg2[%c0_6, %c0_7] : memref<8x128xf32, #tpu.memory_space<vmem>>, vector<8x128xf32>
    %13 = vector.shape_cast %12 : vector<8x128xf32> to vector<1x8x128xf32>
    %14 = vector.broadcast %13 : vector<1x8x128xf32> to vector<2x8x128xf32>
    %15 = arith.addf %11, %14 : vector<2x8x128xf32>
    %16 = vector.shape_cast %15 : vector<2x8x128xf32> to vector<16x128xf32>
    %c0_8 = arith.constant 0 : index
    %c0_9 = arith.constant 0 : index
    %17 = vector.load %arg3[%c0_8, %c0_9] : memref<16x128xf32, #tpu.memory_space<vmem>>, vector<16x128xf32>
    tpu.vector_store %arg3[%c0_8, %c0_9], %16 {strides = array<i32>} : memref<16x128xf32, #tpu.memory_space<vmem>>, vector<16x128xf32>,
    return
  }
}

</mosaic_0001>

<bundles_post_ra>
// kernel: tpu_custom_call.1
= control target key start
LH: loop header
LB: loop body
LE: loop exit
PB: predicated region body
PF: predicated region fallthrough
CT: control target
= control target key end

     0   :  { %8 = vsyncpa [#allocation3], 0  ;;  %s324_s0 = inlined_call_operand.vmem [shape: s32[16,1], index: 0, kind: input, shape index: {}]   ;;  %s325_s1 = inlined_call_operand.hbm [shape: f32[64,128], index: 1, kind: input, shape index: {}]   ;;  %s326_s2 = inlined_call_operand.vmem [shape: f32[8,128], index: 2, kind: input, shape index: {}]   ;;  %s327_s3 = inlined_call_operand.hbm [shape: f32[16,128], index: 3, kind: output, shape index: {}]  }
   0x1   :  { %9 = vsyncpa [#allocation4], 0  ;;  %s259_s12 = smov [#allocation2]   ;;  %s211_s16 = scalar_lea.hbm %s325_s1, 1024 }
   0x2   :  { %s17_s13 = sshll.u32 %s259_s12, 4  ;;  %p212_p0 = scmp.ne.s32.totalorder %s325_s1, %s211_s16  ;;  %s18_s13 = int_to_ptr.vmem [resolvable:$true] %s17_s13 }
   0x3   :  { %p215_p1 = scmp.lt.u32.totalorder %s211_s16, %s325_s1 }
   0x5   :  { %p217_p2 = pnand %p215_p1, %p212_p0 }
   0x7   :  { %220 = shalt.err (!%p217_p2)
}
   0x8   :  { %s221_s21 = scalar_lea.vmem %s18_s13, 1024  ;;  %p226_p4 = scmp.lt.s32.totalorder %s18_s13, %s18_s13 }
   0x9   :  { %p222_p3 = scmp.ne.s32.totalorder %s18_s13, %s221_s21  ;;  %p227_p5 = scmp.lt.s32.totalorder %s221_s21, %s221_s21 }
   0xb   :  { %p228_p6 = por %p227_p5, %p226_p4 }
   0xd   :  { %p229_p7 = pnand %p228_p6, %p222_p3 }
   0xf   :  { %232 = shalt.err (!%p229_p7)
}
  0x10   :  { %s260_s22 = smov 128   ;;  %s261_s23 = smov 8  }
  0x11   :  { %23 = dma.hbm_to_vmem [thread:$0]  %s325_s1, 1024, %s18_s13, [#allocation3], %s260_s22, %s260_s22, %s261_s23  }
  0x12   :  { %255 = dma.done.wait [#allocation3], 1024  }
  0x13   :  { %256 = vsyncadd [#allocation3], 4294966272  ;;  %v262_v0 = vmov 0   ;;  %v29_v1 = vld [vmem:[%s324_s0] sm:$0xff]  ;;  %v43_v2 = vld [vmem:[#allocation2] sm:$0xff]  ;;  %v31_v15 = vlaneseq  ;;  %vm51_vm0 = vcmask 523264  }
  0x14   :  { %210 = vset.pattern.permute.xlu0 %v262_v0  ;;  %v44_v3 = vld [vmem:[#allocation2 + $0x8] sm:$0xff]  ;;  %v45_v4 = vld [vmem:[#allocation2 + $0x10] sm:$0xff]  ;;  %v46_v5 = vld [vmem:[#allocation2 + $0x18] sm:$0xff]  ;;  %v263_v18 = vmov 0.0   ;;  %s264_s30 = smov [#allocation5]  }
  0x15   :  { %34 = vperm.xlu0 %210, %v29_v1   ;;  %v30_v6 = vld [vmem:[%s324_s0 + $0x8] sm:$0xff]  ;;  %v188_v7 = vpack.c.bf16 %v44_v3, %v43_v2  ;;  %v192_v8 = vpack.c.bf16 %v46_v5, %v45_v4  ;;  %v47_v9 = vld [vmem:[#allocation2 + $0x20] sm:$0xff]  ;;  %v48_v10 = vld [vmem:[#allocation2 + $0x28] sm:$0xff]  ;;  %v32_v16 = vand.u32 127, %v31_v15  ;;  %s145_s4 = sshll.u32 %s264_s30, 4  ;;  %s146_s4 = int_to_ptr.vmem [resolvable:$true] %s145_s4 }
  0x16   :  { %v196_v11 = vpack.c.bf16 %v48_v10, %v47_v9  ;;  %v49_v12 = vld [vmem:[#allocation2 + $0x30] sm:$0xff]  ;;  %v50_v13 = vld [vmem:[#allocation2 + $0x38] sm:$0xff]  ;;  %v135_v23 = vld [vmem:[%s326_s2] sm:$0xff]  ;;  %s233_s5 = scalar_lea.vmem %s146_s4, 256  ;;  %p238_p9 = scmp.lt.s32.totalorder %s146_s4, %s146_s4 }
  0x17   :  { %189 = vmatprep.subr.bf16.mxu0 %v188_v7  ;;  %v200_v14 = vpack.c.bf16 %v50_v13, %v49_v12  ;;  %p234_p8 = scmp.ne.s32.totalorder %s146_s4, %s233_s5  ;;  %p239_p10 = scmp.lt.s32.totalorder %s233_s5, %s233_s5 }
  0x18   :  { %191 = vmatpush3.bf16.msra.mxu0 %v188_v7 }
  0x19   :  { %37 = vperm.xlu0 %210, %v30_v6   ;;  %193 = vmatprep.subr.bf16.mxu0 %v192_v8  ;;  %p240_p11 = por %p239_p10, %p238_p9 }
  0x1b   :  { %p241_p12 = pnand %p240_p11, %p234_p8 }
  0x1c   :  { %195 = vmatpush3.bf16.msra.mxu0 %v192_v8 }
  0x1d   :  { %197 = vmatprep.subr.bf16.mxu0 %v196_v11 }
  0x20   :  { %199 = vmatpush3.bf16.msra.mxu0 %v196_v11 }
  0x21   :  { %201 = vmatprep.subr.bf16.mxu0 %v200_v14 }
  0x24   :  { %203 = vmatpush3.bf16.msra.mxu0 %v200_v14 }
  0x94   :  { %v35_v17 = vpop.permute.xlu0 %34 }
  0x95   :  { %vm39_vm1 = vcmp.eq.s32.totalorder %v32_v16, %v35_v17 }
  0x96   :  { %v41_v19 = vsel %vm39_vm1, 1.0, %v263_v18 }
  0x97   :  { %185 = vmatprep.mubr.msk.f32.mxu0 %vm51_vm0, %v41_v19 }
  0x98   :  { %v38_v20 = vpop.permute.xlu0 %37 }
  0x99   :  { %vm40_vm2 = vcmp.eq.s32.totalorder %v32_v16, %v38_v20 }
  0x9a   :  { %v42_v21 = vsel %vm40_vm2, 1.0, %v263_v18 }
  0x9b   :  { %186 = vmatmul.mubr.msk.f32.vlgmr.msra.gmra.mrb[0].mxu0 %vm51_vm0, %v42_v21 }
 0x16e   :  { %v187_v22 = vpop.f32.mrb[0].mxu0 }
 0x16f   :  { %v134_v24 = vmul.f32 11.313708, %v187_v22  ;;  %v124_v25 = vpop.f32.mrb[1].mxu0 }
 0x170   :  { %v133_v26 = vmul.f32 11.313708, %v124_v25 }
 0x171   :  { %v137_v27 = vadd.f32 %v135_v23, %v134_v24 }
 0x172   :  { %v136_v28 = vadd.f32 %v135_v23, %v133_v26 }
 0x173   :  { %139 = vst [vmem:[#allocation5 + $0x8] sm:$0xff] %v137_v27 }
 0x174   :  { %138 = vst [vmem:[#allocation5] sm:$0xff] %v136_v28 }
 0x175   :  { %244 = shalt.err (!%p241_p12)
}
 0x176   :  { %s245_s2 = scalar_lea.hbm %s327_s3, 256 }
 0x177   :  { %p246_p13 = scmp.ne.s32.totalorder %s327_s3, %s245_s2  ;;  %p249_p0 = scmp.lt.u32.totalorder %s245_s2, %s327_s3 }
 0x179   :  { %p251_p1 = pnand %p249_p0, %p246_p13 }
 0x17b   :  { %254 = shalt.err (!%p251_p1)
}
 0x17c   :  { %151 = dma.vmem_to_hbm [thread:$0]  %s146_s4, 256, %s327_s3, [#allocation4], %s260_s22, %s260_s22, %s261_s23  }
 0x17d   :  { %257 = dma.done.wait [#allocation4], 256  }
 0x17e   :  { %258 = vsyncadd [#allocation4], 4294967040 }
 0x17f   :  { %155 = vsyncpa [#allocation3], 1 }
 0x180   :  { %156 = vsyncpa [#allocation4], 1 }

</bundles_post_ra>
